<compile_context>
chip_gen: v7x
topology: tpu7x:2x2x1
jax: 0.10.0
libtpu: 0.0.40
codegen_flags: <defaults>
</compile_context>

<pallas_src>
import jax
import jax.numpy as jnp
from jax import lax
from jax.experimental import pallas as pl
from jax.experimental.pallas import tpu as pltpu


_LANE = 128
_K_CHUNK = 64          # per-matmul contraction cap for the W > 128 path


def _ceil_to(x, mult):
    return -(-x // mult) * mult


def _sublane(itemsize):
    # sublane packing: f32 -> 8, bf16/f16 -> 16, int8/fp8 -> 32
    return max(8, 32 // max(1, itemsize))


def _choose_fold(n_rows, w, sub):
    """Rows folded per stored output row.

    Guarantees output row length 4*F*W >= 128 lanes (lane-dense stores) while
    keeping K = F*W <= 128 (MXU hidden under DMA).  Prefers K a multiple of
    128, then 32, and keeps enough stored rows for >= 4 grid steps.
    Returns (fold, row_padding)."""
    if w >= 32:
        return 1, 0                        # one row per stored row is lane-dense
    fmin = -(-32 // w)                     # ceil(32 / W): 4*F*W >= 128
    fmax = max(fmin, 128 // w)             # K = F*W <= 128
    if n_rows >= 4 * sub * fmin:           # leave >= 4 tiles of >= sub rows
        fmax = max(fmin, min(fmax, n_rows // (4 * sub)))
    best = None
    for f in range(fmin, fmax + 1):
        if n_rows % f:
            continue
        k = f * w
        score = (2 if k % 128 == 0 else 1 if k % 32 == 0 else 0, k)
        if best is None or score > best[0]:
            best = (score, f)
    if best is not None:
        return best[1], 0
    # No divisor of n_rows in range: pad with < fmin zero rows (sliced off
    # after the kernel) rather than degrading to <128-lane masked stores.
    return fmin, (-n_rows) % fmin


def _pick_row_tile(m, kdim, ndim, itemsize, sub):
    """Row tile: multiple of the sublane packing, double-buffered (lane-padded)
    in+out blocks <= ~12 MiB (fits v5e's 16 MiB scoped default with room for
    the <=512 KiB double-buffered G), and >= 4 grid steps when possible."""
    in_row = _ceil_to(kdim, _LANE) * itemsize      # VMEM lane-padded row bytes
    out_row = _ceil_to(ndim, _LANE) * itemsize
    budget = 12 << 20
    cap = max(sub, int(budget // (2 * (in_row + out_row))) // sub * sub)
    tr = _ceil_to(max(1, -(-m // 4)), sub)         # aim for >= 4 grid steps
    return max(sub, min(cap, tr))


def _single_matmul_kernel(acc_dtype):
    # o = x @ G with block-diagonal 0/1 G: exact copy (one 1 per column),
    # one lane-dense store per block.
    def kernel(x_ref, g_ref, o_ref):
        o_ref[...] = jnp.dot(
            x_ref[...], g_ref[...], preferred_element_type=acc_dtype
        ).astype(o_ref.dtype)

    return kernel


def _chunked_kernel(chunks, two_w, acc_dtype):
    # W > 128 path: duplicate the width in K <= 64 column chunks so MXU work
    # per HBM byte stays tiny; each duplicated chunk is stored into both row
    # copies of the 4W stored row.  `chunks` / offsets are static.
    def kernel(x_ref, g_ref, o_ref):
        for c0, c1 in chunks:
            kb = c1 - c0
            dup = jnp.dot(
                x_ref[:, c0:c1],
                g_ref[:kb, : 2 * kb],
                preferred_element_type=acc_dtype,
            ).astype(o_ref.dtype)
            o_ref[:, 2 * c0 : 2 * c1] = dup
            o_ref[:, two_w + 2 * c0 : two_w + 2 * c1] = dup

    return kernel


def upsample2x(x):
    """2x nearest-neighbor upsample of an NCHW tensor (== the torch module)."""
    if not jnp.issubdtype(x.dtype, jnp.floating):
        # Exact for |int| < 2^24; the reference module only sees float maps.
        return upsample2x(x.astype(jnp.float32)).astype(x.dtype)

    b, c, h, w = x.shape
    dtype = x.dtype
    itemsize = jnp.dtype(dtype).itemsize
    sub = _sublane(itemsize)
    # bf16: emit the MXU result directly in bf16 (exact; avoids an f32 cast pass).
    acc_dtype = jnp.bfloat16 if dtype == jnp.bfloat16 else jnp.float32

    n_rows = b * c * h                       # every (b, c, i) source row
    fold, pad = _choose_fold(n_rows, w, sub)
    m = (n_rows + pad) // fold               # stored output rows
    kdim = fold * w                          # input row length (matmul K)
    ndim = 4 * fold * w                      # output row length (>= 128 lanes)

    chunked = w > 128                        # fold == 1 here; cap per-matmul K
    if chunked:
        chunks = tuple(
            (c0, min(c0 + _K_CHUNK, w)) for c0 in range(0, w, _K_CHUNK)
        )
        kb = min(_K_CHUNK, w)
        # duplication matrix: G[j, mm] = 1  iff  j == mm // 2
        jj = lax.broadcasted_iota(jnp.int32, (kb, 2 * kb), 0)
        mm = lax.broadcasted_iota(jnp.int32, (kb, 2 * kb), 1)
        g = (jj == mm // 2).astype(dtype)
        kernel = _chunked_kernel(chunks, 2 * w, acc_dtype)
        macs = m * sum(2 * (c1 - c0) * (c1 - c0) for c0, c1 in chunks)
    else:
        # Block-diagonal 0/1 duplication matrix, built once (hoisted out of the
        # grid loop):  G[f*W + j, f*4W + mm] = 1  iff  j == (mm % 2W) // 2
        row = lax.broadcasted_iota(jnp.int32, (kdim, ndim), 0)
        col = lax.broadcasted_iota(jnp.int32, (kdim, ndim), 1)
        f_row, j = row // w, row % w
        f_col, mm = col // (4 * w), col % (4 * w)
        g = ((f_row == f_col) & (j == (mm % (2 * w)) // 2)).astype(dtype)
        kernel = _single_matmul_kernel(acc_dtype)
        macs = m * ndim * kdim

    xr = x.reshape(n_rows, w)
    if pad:
        xr = jnp.pad(xr, ((0, pad), (0, 0)))
    xr = xr.reshape(m, kdim)                 # memory-identical view of x

    tr = _pick_row_tile(m, kdim, ndim, itemsize, sub)
    grid = pl.cdiv(m, tr)                    # masked last block if tr !| m

    cost = pl.CostEstimate(                  # tell XLA this is a bandwidth-bound copy
        flops=int(2 * macs),
        transcendentals=0,
        bytes_accessed=int((m * kdim + m * ndim + g.size) * itemsize),
    )

    out = pl.pallas_call(
        kernel,
        out_shape=jax.ShapeDtypeStruct((m, ndim), dtype),
        grid_spec=pltpu.PrefetchScalarGridSpec(
            num_scalar_prefetch=0,
            grid=(grid,),
            in_specs=[
                pl.BlockSpec((tr, kdim), lambda i: (i, 0)),
                pl.BlockSpec(g.shape, lambda i: (0, 0)),   # resident constant (<=256 KiB)
            ],
            out_specs=pl.BlockSpec((tr, ndim), lambda i: (i, 0)),
        ),
        compiler_params=pltpu.CompilerParams(
            dimension_semantics=("parallel",),
        ),
        cost_estimate=cost,
    )(xr, g)

    # (m, 4*F*W) is memory-identical to (B, C, 2H, 2W), minus any fold padding.
    if pad:
        out = out.reshape(-1)[: n_rows * 4 * w]
    return out.reshape(b, c, 2 * h, 2 * w)


if __name__ == "__main__":
    # The module has no learnable parameters; only the input is needed.
    key = jax.random.PRNGKey(0)
    x = jax.random.normal(key, (2, 4, 16, 16), dtype=jnp.float32)

    out = jax.jit(upsample2x)(x)
    out = jax.block_until_ready(out)

    # Sanity-check against the pure-JAX nearest-neighbor reference
    # (equivalent to the torch view/cat/split construction).
    ref = jnp.repeat(jnp.repeat(x, 2, axis=2), 2, axis=3)
    assert out.shape == (2, 4, 32, 32)
    assert out.dtype == x.dtype
    assert jnp.allclose(out, ref), "mismatch vs nearest-neighbor reference"

    print("KERNEL_OK")
</pallas_src>

<mosaic_0001>
module attributes {stable_mosaic.version = 11 : i64} {
  func.func @kernel(%arg0: i32, %arg1: memref<8x64xf32, #tpu.memory_space<vmem>>, %arg2: memref<64x256xf32, #tpu.memory_space<vmem>>, %arg3: memref<8x256xf32, #tpu.memory_space<vmem>>) attributes {dimension_semantics = [#tpu.dimension_semantics<parallel>], iteration_bounds = array<i64: 4>, scalar_prefetch = 0 : i64, scratch_operands = 0 : i64, tpu.core_type = #tpu.core_type<tc>, window_params = [{transform_indices = @transform_0, window_bounds = array<i64: 8, 64>}, {pipeline_mode = #tpu.pipeline_mode<synchronous>, transform_indices = @transform_1, window_bounds = array<i64: 64, 256>}, {transform_indices = @transform_2, window_bounds = array<i64: 8, 256>}]} {
    %c0 = arith.constant 0 : index
    %c0_0 = arith.constant 0 : index
    %0 = vector.load %arg1[%c0, %c0_0] : memref<8x64xf32, #tpu.memory_space<vmem>>, vector<8x64xf32>
    %c0_1 = arith.constant 0 : index
    %c0_2 = arith.constant 0 : index
    %1 = vector.load %arg2[%c0_1, %c0_2] : memref<64x256xf32, #tpu.memory_space<vmem>>, vector<64x256xf32>
    %cst = arith.constant dense<0.000000e+00> : vector<8x256xf32>
    %2 = tpu.matmul %0, %1, %cst {dimension_numbers = #tpu.dot_dimension_numbers<[1], [0], [0], [1], [0, 0, 1, 1], [], []>} : vector<8x64xf32>, vector<64x256xf32>, vector<8x256xf32> -> vector<8x256xf32>
    %c0_3 = arith.constant 0 : index
    %c0_4 = arith.constant 0 : index
    %3 = vector.load %arg3[%c0_3, %c0_4] : memref<8x256xf32, #tpu.memory_space<vmem>>, vector<8x256xf32>
    tpu.vector_store %arg3[%c0_3, %c0_4], %2 {strides = array<i32>} : memref<8x256xf32, #tpu.memory_space<vmem>>, vector<8x256xf32>,
    return
  }
  func.func @transform_0(%arg0: i32) -> (i32, i32) {
    %c0_i32 = arith.constant 0 : i32
    %c0_i32_0 = arith.constant 0 : i32
    return %arg0, %c0_i32 : i32, i32
  }
  func.func @transform_1(%arg0: i32) -> (i32, i32) {
    %c0_i32 = arith.constant 0 : i32
    %c0_i32_0 = arith.constant 0 : i32
    %c0_i32_1 = arith.constant 0 : i32
    return %c0_i32, %c0_i32_0 : i32, i32
  }
  func.func @transform_2(%arg0: i32) -> (i32, i32) {
    %c0_i32 = arith.constant 0 : i32
    %c0_i32_0 = arith.constant 0 : i32
    return %arg0, %c0_i32 : i32, i32
  }
}

</mosaic_0001>

<bundles_post_ra>
// kernel: upsample2x.1
= control target key start
LH: loop header
LB: loop body
LE: loop exit
PB: predicated region body
PF: predicated region fallthrough
CT: control target
= control target key end

     0   :  { %s351_s9 = smov 0   ;;  %s420_s0 = inlined_call_operand.vmem [shape: f32[32,64], index: 0, kind: input, shape index: {}]   ;;  %s421_s1 = inlined_call_operand.vmem [shape: f32[64,256], index: 1, kind: input, shape index: {}]   ;;  %s422_s2 = inlined_call_operand.vmem [shape: f32[32,256], index: 2, kind: output, shape index: {}]  }
   0x1 LB: > { %s290_s10 = sadd.s32 4294967295, %s333_s9   ;;  %p294_p0 = scmp.ge.s32.totalorder %s333_s9, 1  ;;  %s333_s9 = sphi %s351_s9, %s12_s9  }
   0x2   : > { %p111_p1 = scmp.lt.s32.totalorder %s333_s9, 5 }
   0x4   : > { %p112_p2 = pnand %p294_p0, %p111_p1 }
   0x5   : > { %v143_v0 = vld [vmem:[%s421_s1 + $0x8] sm:$0xff] (!%p112_p2)  ;;  %v145_v1 = vld [vmem:[%s421_s1 + $0x18] sm:$0xff] (!%p112_p2)  ;;  %v142_v2 = vld [vmem:[%s421_s1] sm:$0xff] (!%p112_p2)  ;;  %v335_v7 = vmov (!%p112_p2), 0.0   ;;  %p132_p3 = scmp.lt.s32.totalorder (!%p112_p2), %s290_s10, 3  ;;  %vm158_vm0 = vcmask (!%p112_p2), 523264  }
   0x6   : > { %115 = sbr.rel (%p112_p2) target bundleno = 238 (0xee), region = 28  ;;  %v302_v3 = vpack.c.bf16 (!%p112_p2), %v145_v1, %v143_v0  ;;  %v144_v4 = vld [vmem:[%s421_s1 + $0x10] sm:$0xff] (!%p112_p2)  ;;  %v147_v5 = vld [vmem:[%s421_s1 + $0x28] sm:$0xff] (!%p112_p2)  ;;  %v149_v6 = vld [vmem:[%s421_s1 + $0x38] sm:$0xff] (!%p112_p2)  ;;  %226 = vmatprep.mubr.f32.mxu0 (!%p112_p2), %v335_v7 }
   0x7   : > { %v304_v8 = vpack.c.bf16 (!%p112_p2), %v144_v4, %v142_v2  ;;  %v306_v9 = vpack.c.bf16 (!%p112_p2), %v149_v6, %v147_v5  ;;  %v146_v10 = vld [vmem:[%s421_s1 + $0x20] sm:$0xff] (!%p112_p2)  ;;  %v148_v11 = vld [vmem:[%s421_s1 + $0x30] sm:$0xff] (!%p112_p2)  ;;  %v151_v12 = vld [vmem:[%s421_s1 + $0x48] sm:$0xff] (!%p112_p2) }
   0x8   : > { %303 = vmatprep.subr.bf16.mxu0 (!%p112_p2), %v302_v3  ;;  %v153_v13 = vld [vmem:[%s421_s1 + $0x58] sm:$0xff] (!%p112_p2)  ;;  %v308_v14 = vpack.c.bf16 (!%p112_p2), %v148_v11, %v146_v10  ;;  %v150_v16 = vld [vmem:[%s421_s1 + $0x40] sm:$0xff] (!%p112_p2)  ;;  %v152_v17 = vld [vmem:[%s421_s1 + $0x50] sm:$0xff] (!%p112_p2) }
   0x9   : > { %305 = vmatpush1.bf16.msra.mxu0 (!%p112_p2), %v304_v8  ;;  %v310_v15 = vpack.c.bf16 (!%p112_p2), %v153_v13, %v151_v12  ;;  %v155_v18 = vld [vmem:[%s421_s1 + $0x68] sm:$0xff] (!%p112_p2)  ;;  %v157_v19 = vld [vmem:[%s421_s1 + $0x78] sm:$0xff] (!%p112_p2)  ;;  %v312_v20 = vpack.c.bf16 (!%p112_p2), %v152_v17, %v150_v16  ;;  %v154_v22 = vld [vmem:[%s421_s1 + $0x60] sm:$0xff] (!%p112_p2) }
   0xa   : > { %307 = vmatprep.subr.bf16.mxu0 (!%p112_p2), %v306_v9  ;;  %v314_v21 = vpack.c.bf16 (!%p112_p2), %v157_v19, %v155_v18  ;;  %v156_v23 = vld [vmem:[%s421_s1 + $0x70] sm:$0xff] (!%p112_p2) }
   0xb   : > { %v316_v24 = vpack.c.bf16 (!%p112_p2), %v156_v23, %v154_v22 }
   0xd   : > { %s424_s10 = smov (!%p132_p3, %s290_s10), 3  ;;  %309 = vmatpush1.bf16.msra.mxu0 %v308_v14 }
   0xe   : > { %311 = vmatprep.subr.bf16.mxu0 %v310_v15  ;;  %s295_s17 = sshll.u32 %s424_s10, 3  ;;  %s301_s21 = sshll.u32 %s424_s10, 4 }
   0xf   : > { %s135_s20 = scalar_lea.vmem %s420_s0, %s295_s17  ;;  %s140_s24 = scalar_lea.vmem %s422_s2, %s301_s21 }
  0x10   : > { %v141_v25 = vld [vmem:[%s135_s20] sm:$0xff] }
  0x11   : > { %313 = vmatpush1.bf16.msra.mxu0 %v312_v20 }
  0x12   : > { %315 = vmatprep.subr.bf16.mxu0 %v314_v21 }
  0x15   : > { %317 = vmatpush1.bf16.msra.mxu0 %v316_v24 }
  0x18   : > { %298 = vmatmul.mubr.msk.f32.vlgmr.msra.gmra.mrb[0].mxu0 %vm158_vm0, %v141_v25 }
  0xeb   : > { %v228_v26 = vpop.f32.mrb[0].mxu0 }
  0xec   : > { %233 = vst [vmem:[%s140_s24] sm:$0xff] %v228_v26  ;;  %v230_v27 = vpop.f32.mrb[1].mxu0 }
  0xed   : > { %234 = vst [vmem:[%s140_s24 + $0x8] sm:$0xff] %v230_v27 }
  0xee PF: > { %s12_s9 = sadd.s32 1, %s333_s9  }
  0xef   : > { %p9_p4 = scmp.ge.s32.totalorder %s12_s9, 6  }
  0xf1   :  { %11 = sbr.rel (!%p9_p4) target bundleno = 1 (0x1), region = 58 }

</bundles_post_ra>
